<compile_context>
chip_gen: v6e
topology: v6e:2x2x1
jax: 0.10.0
libtpu: 0.0.40
codegen_flags: <defaults>
</compile_context>

<pallas_src>
import functools

import jax
import jax.numpy as jnp
from jax.experimental import pallas as pl
from jax.experimental.pallas import tpu as pltpu


def _round_up(x, m):
    return ((x + m - 1) // m) * m


def _pick_tile(padded_dim, cap):
    """Largest multiple-of-128 divisor of `padded_dim` (a multiple of 128) <= cap."""
    q = padded_dim // 128
    best = 1
    for d in range(1, q + 1):
        if q % d == 0 and 128 * d <= cap:
            best = d
    return 128 * best


def _vmem_caps():
    """Generation-aware VMEM budget (working-set budget, vmem_limit cap, raw cap, detected)."""
    cap = None
    try:
        info = pltpu.get_tpu_info()
        cap = int(getattr(info, "vmem_capacity_bytes", 0)) or None
    except Exception:
        cap = None
    detected = cap is not None
    if cap is None:
        cap = 64 * 2**20          # v7x-safe fallback (64 MiB per TensorCore)
    budget = int(cap * 0.70)
    limit_cap = int(cap * 0.80)
    return budget, limit_cap, cap, detected


def _backsub_kernel(lhs_ref, w_ref, out_ref, *, lhs_resident):
    """One (i, j, k) grid step of out = lhs_padded @ w_padded.

    Grid: i = M row-block (parallel), j = N tile (parallel), k = K reduction
    tile (arbitrary, innermost). The output block index (i, j) is constant
    across k, so out_ref is VMEM-resident and used directly as the f32
    accumulator (no scratch).
    """
    k = pl.program_id(2)
    tk = w_ref.shape[0]

    if lhs_resident:
        # lhs block is (tm, Kp), resident across the whole K extent.
        k_off = pl.multiple_of(k * tk, tk)
        lhs_t = lhs_ref[:, pl.ds(k_off, tk)]
    else:
        # streamed (tm, tk) tile
        lhs_t = lhs_ref[...]

    # NOTE: for strict DeepPoly soundness one may want an explicit
    # highest-precision MXU setting here; validated numerically below.
    contrib = jnp.dot(lhs_t, w_ref[...], preferred_element_type=jnp.float32)

    @pl.when(k == 0)
    def _():
        out_ref[...] = contrib          # write-through init, no zero-fill pass

    @pl.when(k != 0)
    def _():
        out_ref[...] += contrib


class _PreparedWeights:
    """Static per-layer prep: bias fused as one extra lane-dense column of the
    weight matrix, padded to (Kp, Np) tile multiples. Computed once per layer."""

    def __init__(self, weights, biases, *, tk_cap=512, tn_cap=512):
        weights = jnp.asarray(weights, jnp.float32)    # [K, N] == torch [out, in]
        biases = jnp.asarray(biases, jnp.float32)      # [K]
        K, N = weights.shape
        assert biases.shape == (K,)
        n_aug = N + 1
        Kp = _round_up(K, 128)
        Np = _round_up(n_aug, 128)
        self.tk = _pick_tile(Kp, tk_cap)
        self.tn = _pick_tile(Np, tn_cap)
        w_aug = jnp.concatenate([weights, biases[:, None]], axis=1)   # [K, N+1]
        self.w_padded = jnp.pad(w_aug, ((0, Kp - K), (0, Np - n_aug)))  # [Kp, Np]
        self.K, self.N, self.Kp, self.Np = K, N, Kp, Np


def _backsub_stacked(lhs, prep: _PreparedWeights, *, tm_cap=512,
                     force_lhs_resident=None):
    """Core kernel call.

    lhs  : [R, K] stacked constraints (uc rows on top of lc rows)
    prep : prepared (bias-fused, padded) weights of this layer
    Returns (new_lhs [R, N], bias_contrib [R])   with bias_contrib = lhs @ biases.
    """
    lhs = jnp.asarray(lhs, jnp.float32)
    R, K = lhs.shape
    assert K == prep.K
    Kp, Np, tk = prep.Kp, prep.Np, prep.tk
    tn = prep.tn

    budget, limit_cap, cap, detected = _vmem_caps()
    two_core_likely = detected and cap <= 64 * 2**20   # v7x proxy (2 TC / chip)

    # ---- row-block (M) tiling: each (tm, Kp) LHS block stays VMEM-resident --
    Rp8 = _round_up(max(R, 8), 8)            # pad rows to a sublane multiple
    tm = Rp8 if Rp8 <= tm_cap else tm_cap
    Rp = _round_up(Rp8, tm)

    def working_set(resident, tm_):
        lhs_b = tm_ * (Kp if resident else tk) * 4 * 2   # double-buffered
        w_b = tk * tn * 4 * 2
        out_b = tm_ * tn * 4 * 2
        return lhs_b + w_b + out_b

    lhs_resident = working_set(True, tm) <= budget
    while not lhs_resident and tm > 8:
        tm = max(8, ((tm // 2) + 7) // 8 * 8)
        Rp = _round_up(Rp8, tm)
        lhs_resident = working_set(True, tm) <= budget
    if force_lhs_resident is not None:
        lhs_resident = bool(force_lhs_resident)

    i_blocks = Rp // tm
    j_blocks = Np // tn
    # v7x megacore: make sure there are >= 2 parallel blocks to feed both TCs.
    if two_core_likely and i_blocks * j_blocks < 2 and Np // 128 >= 2:
        tn = _pick_tile(Np, Np // 2)
        j_blocks = Np // tn
    k_blocks = Kp // tk
    grid = (i_blocks, j_blocks, k_blocks)

    lhs_p = jnp.pad(lhs, ((0, Rp - R), (0, Kp - K)))

    if lhs_resident:
        lhs_spec = pl.BlockSpec((tm, Kp), lambda i, j, k: (i, 0))
    else:
        lhs_spec = pl.BlockSpec((tm, tk), lambda i, j, k: (i, k))
    w_spec = pl.BlockSpec((tk, tn), lambda i, j, k: (k, j))
    out_spec = pl.BlockSpec((tm, tn), lambda i, j, k: (i, j))

    vmem_limit = int(min(limit_cap,
                         max(int(1.5 * working_set(lhs_resident, tm)), 32 * 2**20)))

    lhs_reads = 1 if lhs_resident else j_blocks
    cost = pl.CostEstimate(
        flops=2 * Rp * Kp * Np,
        transcendentals=0,
        bytes_accessed=4 * (lhs_reads * Rp * Kp + i_blocks * Kp * Np + Rp * Np),
    )

    out = pl.pallas_call(
        functools.partial(_backsub_kernel, lhs_resident=lhs_resident),
        out_shape=jax.ShapeDtypeStruct((Rp, Np), jnp.float32),
        grid_spec=pltpu.PrefetchScalarGridSpec(
            num_scalar_prefetch=0,
            grid=grid,
            in_specs=[lhs_spec, w_spec],
            out_specs=out_spec,
        ),
        compiler_params=pltpu.CompilerParams(
            dimension_semantics=("parallel", "parallel", "arbitrary"),
            vmem_limit_bytes=vmem_limit),
        cost_estimate=cost,
    )(lhs_p, prep.w_padded)

    N = prep.N
    new_lhs = out[:R, :N]           # columns [0, N): lhs @ weights
    bias_contrib = out[:R, N]       # column N carries the fused bias matvec
    return new_lhs, bias_contrib


def backsubstitute_linear(uc, lc, uc_bias, lc_bias, weights, biases,
                          *, force_lhs_resident=None):
    """Standalone Pallas implementation of VerifyLinear.backsubstitute for one
    layer (prepares / pads the weights per call; prefer VerifyLinearPallas for
    repeated use)."""
    uc = jnp.asarray(uc, jnp.float32)
    lc = jnp.asarray(lc, jnp.float32)
    uc_bias = jnp.asarray(uc_bias, jnp.float32)
    lc_bias = jnp.asarray(lc_bias, jnp.float32)
    M = uc.shape[0]
    prep = _PreparedWeights(weights, biases)
    lhs = jnp.concatenate([uc, lc], axis=0)
    new_lhs, bias_contrib = _backsub_stacked(
        lhs, prep, force_lhs_resident=force_lhs_resident)
    new_bias = jnp.concatenate([uc_bias, lc_bias], axis=0) + bias_contrib
    return new_lhs[:M], new_lhs[M:], new_bias[:M], new_bias[M:]


class VerifyLinearPallas:
    """JAX mirror of VerifyLinear: holds this layer's (weights, biases) and a
    `previous` layer through which constraints are backsubstituted. Constraints
    travel through the chain in the stacked [2M, K] layout and are split into
    uc/lc only at the very end."""

    def __init__(self, weights, biases, previous=None):
        self.weights = jnp.asarray(weights, jnp.float32)   # [out, in]
        self.biases = jnp.asarray(biases, jnp.float32)     # [out]
        self.previous = previous
        self.bounds = None
        # bias-fused + padded weights prepared once (static per layer)
        self._prep = _PreparedWeights(self.weights, self.biases)

    # -- stacked-layout chain (internal fast path) --------------------------
    def _backsubstitute_stacked(self, lhs, bias):
        new_lhs, bias_contrib = _backsub_stacked(lhs, self._prep)
        new_bias = bias + bias_contrib
        if self.previous is not None:
            return self.previous._backsubstitute_stacked(new_lhs, new_bias)
        return new_lhs, new_bias

    # -- public API matching the PyTorch module -----------------------------
    def forward(self):
        # ForwardConstraints(uc=W, lc=W, uc_bias=b, lc_bias=b), backsubstituted
        # through every previous layer.
        M = self.weights.shape[0]
        lhs = jnp.concatenate([self.weights, self.weights], axis=0)    # [2M, in]
        bias = jnp.concatenate([self.biases, self.biases], axis=0)     # [2M]
        if self.previous is not None:
            lhs, bias = self.previous._backsubstitute_stacked(lhs, bias)
        # TODO(synk): concretization into input_bounds lives in the (unshown)
        # VerifyInput / ForwardConstraints / BackwardsBounds classes; we return
        # the fully backsubstituted constraints instead.
        self.bounds = (lhs[:M], lhs[M:], bias[:M], bias[M:])
        return self.bounds

    def backsubstitute(self, uc, lc, uc_bias, lc_bias):
        M = uc.shape[0]
        lhs = jnp.concatenate([jnp.asarray(uc, jnp.float32),
                               jnp.asarray(lc, jnp.float32)], axis=0)
        bias = jnp.concatenate([jnp.asarray(uc_bias, jnp.float32),
                                jnp.asarray(lc_bias, jnp.float32)], axis=0)
        lhs, bias = self._backsubstitute_stacked(lhs, bias)
        return lhs[:M], lhs[M:], bias[:M], bias[M:]


if __name__ == "__main__":
    key = jax.random.PRNGKey(0)
    k1, k2, k3, k4, k5, k6 = jax.random.split(key, 6)

    # layer1: Linear(768 -> 640); layer2: Linear(640 -> 384); layer3: Linear(384 -> 48)
    # Sizes chosen so the kernel exercises: multi-tile N (j axis), a multi-step
    # K reduction with out_ref accumulation (layer1 backsub: Kp=640, tk=128),
    # the fused bias column, and K/N/R padding.
    IN1, OUT1, OUT2, OUT3 = 768, 640, 384, 48

    def init_w(k, out_d, in_d):
        return (jax.random.uniform(k, (out_d, in_d), jnp.float32) - 0.5) * (2.0 / jnp.sqrt(in_d))

    def init_b(k, out_d, in_d):
        return (jax.random.uniform(k, (out_d,), jnp.float32) - 0.5) * (2.0 / jnp.sqrt(in_d))

    w1, b1 = init_w(k1, OUT1, IN1), init_b(k2, OUT1, IN1)
    w2, b2 = init_w(k3, OUT2, OUT1), init_b(k4, OUT2, OUT1)
    w3, b3 = init_w(k5, OUT3, OUT2), init_b(k6, OUT3, OUT2)

    layer1 = VerifyLinearPallas(w1, b1, previous=None)
    layer2 = VerifyLinearPallas(w2, b2, previous=layer1)
    layer3 = VerifyLinearPallas(w3, b3, previous=layer2)

    uc, lc, ucb, lcb = layer3.forward()
    jax.block_until_ready((uc, lc, ucb, lcb))

    # reference (plain JAX) check of the backsubstitution semantics
    ref_uc2 = w3 @ w2                    # after backsub through layer2
    ref_ucb2 = b3 + w3 @ b2
    ref_uc1 = ref_uc2 @ w1               # after backsub through layer1
    ref_ucb1 = ref_ucb2 + ref_uc2 @ b1

    assert jnp.allclose(uc, ref_uc1, atol=1e-4, rtol=1e-4)
    assert jnp.allclose(lc, ref_uc1, atol=1e-4, rtol=1e-4)
    assert jnp.allclose(ucb, ref_ucb1, atol=1e-4, rtol=1e-4)
    assert jnp.allclose(lcb, ref_ucb1, atol=1e-4, rtol=1e-4)

    # exercise both kernel paths (VMEM-resident LHS and K-streamed fallback)
    # on the layer with a multi-step K reduction (K=640 -> 5 tk=128 steps).
    for resident in (True, False):
        uc_r, lc_r, ucb_r, lcb_r = backsubstitute_linear(
            ref_uc2, ref_uc2, ref_ucb2, ref_ucb2, w1, b1,
            force_lhs_resident=resident)
        jax.block_until_ready((uc_r, lc_r, ucb_r, lcb_r))
        assert jnp.allclose(uc_r, ref_uc1, atol=1e-4, rtol=1e-4)
        assert jnp.allclose(lc_r, ref_uc1, atol=1e-4, rtol=1e-4)
        assert jnp.allclose(ucb_r, ref_ucb1, atol=1e-4, rtol=1e-4)
        assert jnp.allclose(lcb_r, ref_ucb1, atol=1e-4, rtol=1e-4)

    print("KERNEL_OK")
</pallas_src>

<mosaic_0001>
module attributes {stable_mosaic.version = 11 : i64} {
  func.func @_backsub_kernel(%arg0: i32, %arg1: i32, %arg2: i32, %arg3: memref<96x384xf32, #tpu.memory_space<vmem>>, %arg4: memref<384x384xf32, #tpu.memory_space<vmem>>, %arg5: memref<96x384xf32, #tpu.memory_space<vmem>>) attributes {dimension_semantics = [#tpu.dimension_semantics<parallel>, #tpu.dimension_semantics<parallel>, #tpu.dimension_semantics<arbitrary>], iteration_bounds = array<i64: 1, 2, 1>, scalar_prefetch = 0 : i64, scratch_operands = 0 : i64, tpu.core_type = #tpu.core_type<tc>, window_params = [{transform_indices = @transform_0, window_bounds = array<i64: 96, 384>}, {transform_indices = @transform_1, window_bounds = array<i64: 384, 384>}, {transform_indices = @transform_2, window_bounds = array<i64: 96, 384>}]} {
    %c384_i32 = arith.constant 384 : i32
    %0 = arith.muli %arg2, %c384_i32 : i32
    %1 = tpu.assume_multiple %0, 384 : i32
    %c0 = arith.constant 0 : index
    %2 = arith.index_cast %1 : i32 to index
    %3 = vector.load %arg3[%c0, %2] : memref<96x384xf32, #tpu.memory_space<vmem>>, vector<96x384xf32>
    %c0_0 = arith.constant 0 : index
    %c0_1 = arith.constant 0 : index
    %4 = vector.load %arg4[%c0_0, %c0_1] : memref<384x384xf32, #tpu.memory_space<vmem>>, vector<384x384xf32>
    %cst = arith.constant dense<0.000000e+00> : vector<96x384xf32>
    %5 = tpu.matmul %3, %4, %cst {dimension_numbers = #tpu.dot_dimension_numbers<[1], [0], [0], [1], [0, 0, 1, 1], [], []>} : vector<96x384xf32>, vector<384x384xf32>, vector<96x384xf32> -> vector<96x384xf32>
    %c0_i32 = arith.constant 0 : i32
    %6 = arith.cmpi eq, %arg2, %c0_i32 : i32
    %7 = arith.extui %6 : i1 to i32
    %c0_i32_2 = arith.constant 0 : i32
    %8 = arith.cmpi ne, %7, %c0_i32_2 : i32
    scf.if %8 {
      %c0_5 = arith.constant 0 : index
      %c0_6 = arith.constant 0 : index
      %12 = vector.load %arg5[%c0_5, %c0_6] : memref<96x384xf32, #tpu.memory_space<vmem>>, vector<96x384xf32>
      tpu.vector_store %arg5[%c0_5, %c0_6], %5 {strides = array<i32>} : memref<96x384xf32, #tpu.memory_space<vmem>>, vector<96x384xf32>,
    } else {
    }
    %c0_i32_3 = arith.constant 0 : i32
    %9 = arith.cmpi ne, %arg2, %c0_i32_3 : i32
    %10 = arith.extui %9 : i1 to i32
    %c0_i32_4 = arith.constant 0 : i32
    %11 = arith.cmpi ne, %10, %c0_i32_4 : i32
    scf.if %11 {
      %c0_5 = arith.constant 0 : index
      %c0_6 = arith.constant 0 : index
      %12 = vector.load %arg5[%c0_5, %c0_6] : memref<96x384xf32, #tpu.memory_space<vmem>>, vector<96x384xf32>
      %13 = arith.addf %12, %5 : vector<96x384xf32>
      %c0_7 = arith.constant 0 : index
      %c0_8 = arith.constant 0 : index
      %14 = vector.load %arg5[%c0_7, %c0_8] : memref<96x384xf32, #tpu.memory_space<vmem>>, vector<96x384xf32>
      tpu.vector_store %arg5[%c0_7, %c0_8], %13 {strides = array<i32>} : memref<96x384xf32, #tpu.memory_space<vmem>>, vector<96x384xf32>,
    } else {
    }
    return
  }
  func.func @transform_0(%arg0: i32, %arg1: i32, %arg2: i32) -> (i32, i32) {
    %c0_i32 = arith.constant 0 : i32
    %c0_i32_0 = arith.constant 0 : i32
    return %arg0, %c0_i32 : i32, i32
  }
  func.func @transform_1(%arg0: i32, %arg1: i32, %arg2: i32) -> (i32, i32) {
    %c0_i32 = arith.constant 0 : i32
    return %arg2, %arg1 : i32, i32
  }
  func.func @transform_2(%arg0: i32, %arg1: i32, %arg2: i32) -> (i32, i32) {
    %c0_i32 = arith.constant 0 : i32
    return %arg0, %arg1 : i32, i32
  }
}

</mosaic_0001>

<bundles_post_ra>
// kernel: tpu_custom_call.1
= control target key start
LH: loop header
LB: loop body
LE: loop exit
PB: predicated region body
PF: predicated region fallthrough
CT: control target
= control target key end

     0   :  { %7 = vsyncpa [#allocation3], 0  ;;  %s2155_s0 = inlined_call_operand.hbm [shape: f32[96,384], index: 0, kind: input, shape index: {}]   ;;  %s2156_s1 = inlined_call_operand.hbm [shape: f32[384,768], index: 1, kind: input, shape index: {}]   ;;  %s2157_s2 = inlined_call_operand.hbm [shape: f32[96,768], index: 2, kind: output, shape index: {}]  }
   0x1   :  { %8 = vsyncpa [#allocation6], 0 }
   0x2   :  { %10 = vsyncpa [#allocation6 + $0x1], 0 }
   0x3   :  { %11 = vsyncpa [#allocation4], 0 }
   0x4   :  { %13 = vsyncpa [#allocation4 + $0x1], 0  ;;  %s1640_s9 = smov 0   ;;  %s1642_s10 = smov 0  }
   0x5   :  { %s1644_s11 = smov 0   ;;  %s1646_s12 = smov 0  }
   0x6   :  { %s1648_s13 = smov 0   ;;  %s1650_s14 = smov 0  }
   0x7 LB: > { %2165 = sst [smem:[#allocation11_spill]] %s1613_s14  ;;  %s1201_s15 = sadd.s32 4294967295, %s1613_s14   ;;  %s1613_s14 = sphi %s1650_s14, %s19_s14   ;;  %s1609_s13 = sphi %s1648_s13, %s2188_s13   ;;  %s1605_s12 = sphi %s1646_s12, %s2187_s12   ;;  %s1601_s11 = sphi %s1644_s11, %s2186_s11   ;;  %s1597_s10 = sphi %s1642_s10, %s2185_s10   ;;  %s1593_s9 = sphi %s1640_s9, %s2184_s9  }
   0x8   : > { %s1202_s16 = sadd.s32 4294967294, %s1613_s14   ;;  %p80_p0 = scmp.ne.s32.totalorder %s1601_s11, %s1597_s10 }
   0x9   : > { %p81_p1 = scmp.eq.s32.totalorder %s1613_s14, 0  ;;  %p86_p2 = scmp.ne.s32.totalorder %s1597_s10, %s1593_s9 }
   0xa   : > { %p1678_p3 = scmp.eq.s32.totalorder %s1201_s15, 0  ;;  %p112_p4 = scmp.eq.s32.totalorder %s1201_s15, 1 }
   0xb   : > { %p1682_p5 = por %p81_p1, %p80_p0  ;;  %p118_p6 = scmp.eq.s32.totalorder %s1202_s16, 1 }
   0xc   : > { %s2166_s18 = scalar_select %p1678_p3, 1, 0 }
   0xd   : > { %p1688_p7 = por %p1678_p3, %p86_p2  ;;  %p1692_p8 = por %p112_p4, %p80_p0 }
   0xe   : > { %p1696_p9 = por %p118_p6, %p86_p2  ;;  %p1203_p10 = scmp.ge.s32.totalorder %s1613_s14, 1 }
   0xf   : > { %s2168_s20 = scalar_select %p1688_p7, 1, 0 }
  0x10   : > { %s2169_s21 = scalar_select %p1692_p8, 1, 0 }
  0x11   : > { %s2170_s22 = scalar_select %p1696_p9, 1, 0 }
  0x12   : > { %p125_p11 = scmp.lt.s32.totalorder %s1613_s14, 3  ;;  %s1615_s24 = smov [#allocation2]  }
  0x13   : > { %2171 = sst [smem:[#allocation12_spill]] %s2170_s22  ;;  %s141_s25 = sshll.u32 %s1615_s24, 4  ;;  %s142_s25 = int_to_ptr.vmem [resolvable:$true] %s141_s25 }
  0x14   : > { %p1702_p12 = pnand %p1203_p10, %p125_p11  ;;  %p1416_p1 = scmp.lt.s32.totalorder %s1613_s14, 2 }
  0x15   : > { %s34_s28 = sadd.s32 1, %s1609_s13  ;;  %s1486_s30 = scalar_lea.vmem %s142_s25, 4608 }
  0x16   : > { %p1403_p13 = pneg %p1702_p12  ;;  %p1718_p2 = pnand %p1416_p1, %p1682_p5 }
  0x17   : > { %p1723_p6 = scmp.ge.s32.totalorder %s34_s28, 2  ;;  %p1487_p11 = scmp.ne.s32.totalorder %s142_s25, %s1486_s30 }
  0x18   : > { %p1712_p4 = pnand %p1403_p13, %p1678_p3  ;;  %p1494_p9 = scmp.lt.s32.totalorder %s142_s25, %s142_s25 }
  0x19   : > { %p1495_p8 = scmp.lt.s32.totalorder %s1486_s30, %s1486_s30 }
  0x1a   : > { %p1477_p10 = pneg %p1712_p4 }
  0x1b   : > { %p1496_p7 = por %p1495_p8, %p1494_p9 }
  0x1c   : > { %p1489_p0 = pnand %p1487_p11, %p1477_p10 }
  0x1e   : > { %p1490_p13 = pneg %p1489_p0 }
  0x20   : > { %p1497_p3 = pnand %p1496_p7, %p1490_p13 }
  0x22   : > { %1500 = shalt.err (!%p1497_p3)
}
  0x23   : > { %s1616_s3 = smov 384   ;;  %s1617_s4 = smov 24  }
  0x24   : > { %1406 = dma.hbm_to_vmem [thread:$0]  (!%p1712_p4), %s2155_s0, 4608, %s142_s25, [#allocation3], %s1616_s3, %s1616_s3, %s1617_s4  }
  0x25   : > { %s155_s7 = sand.u32 1, %s1601_s11   ;;  %s2190_s28 = smov (%p1723_p6, %s34_s28), 0 }
  0x26   : > { %s1392_s8 = smul.u32 1152, %s155_s7  ;;  %s69_s15 = ssub.s32 %s1609_s13, %s2190_s28 }
  0x27   : > { %s1212_s16 = smul.u32 384, %s1609_s13  ;;  %p71_p3 = scmp.eq.s32.totalorder %s69_s15, 0 }
  0x28   : > { %s159_s30 = scalar_lea.vmem [#allocation5], %s1392_s8  ;;  %s2176_s14 = sadd.s32 1, %s1601_s11 }
  0x29   : > { %s168_s26 = scalar_lea.hbm %s2156_s1, %s1212_s16  ;;  %s169_s17 = sshll.u32 %s159_s30, 4  ;;  %s170_s17 = int_to_ptr.vmem [resolvable:$true] %s169_s17 }
  0x2a   : > { %s1751_s22 = scalar_select %p71_p3, %s1601_s11, %s2176_s14  }
  0x2b   : > { %s156_s25 = scalar_lea.sflag [#allocation6], %s155_s7  ;;  %p1503_p5 = pneg %p1718_p2 }
  0x2c   : > { %s1514_s29 = scalar_lea.vmem %s170_s17, 18432  ;;  %s1618_s5 = smov [#allocation5]  }
  0x2d   : > { %p1515_p7 = scmp.ne.s32.totalorder %s170_s17, %s1514_s29  ;;  %s1519_s6 = sshll.u32 %s1618_s5, 4  ;;  %s1520_s6 = int_to_ptr.vmem [resolvable:$false] %s1519_s6 }
  0x2e   : > { %s1521_s15 = scalar_lea.vmem %s1520_s6, 36864  ;;  %p1522_p0 = scmp.lt.s32.totalorder %s170_s17, %s1520_s6 }
  0x2f   : > { %p1517_p8 = pnand %p1515_p7, %p1503_p5  ;;  %p1523_p1 = scmp.lt.s32.totalorder %s1521_s15, %s1514_s29 }
  0x31   : > { %p1518_p9 = pneg %p1517_p8  ;;  %p1524_p4 = por %p1523_p1, %p1522_p0 }
  0x33   : > { %p1525_p6 = pnand %p1524_p4, %p1518_p9 }
  0x35   : > { %1528 = shalt.err (!%p1525_p6)
}
  0x36   : > { %s1619_s8 = smov 768   ;;  %181 = sbr.rel (%p1702_p12) target bundleno = 419 (0x1a3), region = 28 }
  0x37   : > { %1410 = dma.hbm_to_vmem [thread:$0]  (!%p1718_p2), %s168_s26, 18432, %s170_s17, %s156_s25, %s1619_s8, %s1616_s3, %s1617_s4  }
  0x38   : > { %p2177_p10 = scmp.ne.s32.totalorder (!%p1702_p12), %s2166_s18, 0 }
  0x3b   : > { %1580 = dma.done.wait (%p2177_p10), [#allocation3], 4608  }
  0x3c   : > { %1582 = vsyncadd (%p2177_p10), [#allocation3], 4294962688  ;;  %s1766_s14 = sand.u32 1, %s1597_s10   ;;  %p2178_p2 = scmp.ne.s32.totalorder %s2168_s20, 0 }
  0x3d   : > { %s1393_s7 = smul.u32 1152, %s1766_s14  ;;  %s188_s27 = scalar_lea.sflag [#allocation6], %s1766_s14 }
  0x3f   : > { %s1770_s16 = scalar_lea.vmem [#allocation5], %s1393_s7 }
  0x40   : > { %1584 = dma.done.wait (%p2178_p2), %s188_s27, 18432  }
  0x41   : > { %1586 = vsyncadd (%p2178_p2), %s188_s27, 4294948864  ;;  %v1620_v0 = vmov 0.0   ;;  %v304_v1 = vld [vmem:[%s1770_s16 + $0x170] sm:$0xff]  ;;  %v303_v3 = vld [vmem:[%s1770_s16 + $0x168] sm:$0xff]  ;;  %s1394_s17 = smul.u32 288, %s1766_s14  ;;  %s1079_s19 = scalar_lea.sflag [#allocation4], %s1766_s14 }
  0x42   : > { %603 = vmatprep.mubr.f32.mxu1 %v1620_v0  ;;  %v400_v2 = vld [vmem:[%s1770_s16 + $0x470] sm:$0xff]  ;;  %402 = vmatprep.subr.mxu0 %v304_v1  ;;  %v399_v4 = vld [vmem:[%s1770_s16 + $0x468] sm:$0xff]  ;;  %v301_v5 = vld [vmem:[%s1770_s16 + $0x158] sm:$0xff]  ;;  %s1213_s20 = smul.u32 384, %s1605_s12  ;;  %p2179_p11 = scmp.ne.s32.totalorder %s2169_s21, 0 }
  0x43   : > { %539 = vmatprep.subr.mxu1 %v400_v2  ;;  %v397_v6 = vld [vmem:[%s1770_s16 + $0x458] sm:$0xff]  ;;  %403 = vmatpush1.msra.mxu0 %v303_v3  ;;  %v300_v7 = vld [vmem:[%s1770_s16 + $0x150] sm:$0xff]  ;;  %v298_v9 = vld [vmem:[%s1770_s16 + $0x140] sm:$0xff]  ;;  %s2033_s18 = scalar_lea.vmem [#allocation7], %s1394_s17  ;;  %s1621_s26 = smov [#allocation7]  }
  0x44   : > { %540 = vmatpush1.msra.mxu1 %v399_v4  ;;  %v396_v8 = vld [vmem:[%s1770_s16 + $0x450] sm:$0xff]  ;;  %404 = vmatprep.subr.mxu0 %v301_v5  ;;  %v394_v10 = vld [vmem:[%s1770_s16 + $0x440] sm:$0xff]  ;;  %v297_v11 = vld [vmem:[%s1770_s16 + $0x138] sm:$0xff]  ;;  %s1095_s23 = sshll.u32 %s2033_s18, 4  ;;  %s2101_s4 = scalar_lea.hbm %s2157_s2, %s1213_s20  ;;  %s2104_s23 = int_to_ptr.vmem [resolvable:$true] %s1095_s23 }
  0x45   : > { %541 = vmatprep.subr.mxu1 %v397_v6  ;;  %v393_v12 = vld [vmem:[%s1770_s16 + $0x438] sm:$0xff]  ;;  %405 = vmatpush1.msra.mxu0 %v300_v7  ;;  %v295_v13 = vld [vmem:[%s1770_s16 + $0x128] sm:$0xff]  ;;  %v294_v15 = vld [vmem:[%s1770_s16 + $0x120] sm:$0xff]  ;;  %s1529_s24 = scalar_lea.vmem %s2104_s23, 4608  ;;  %s1533_s30 = sshll.u32 %s1621_s26, 4  ;;  %s1534_s30 = int_to_ptr.vmem [resolvable:$false] %s1533_s30 }
  0x46   : > { %542 = vmatpush1.msra.mxu1 %v396_v8  ;;  %v391_v14 = vld [vmem:[%s1770_s16 + $0x428] sm:$0xff]  ;;  %406 = vmatprep.subr.mxu0 %v298_v9  ;;  %v390_v16 = vld [vmem:[%s1770_s16 + $0x420] sm:$0xff]  ;;  %v292_v17 = vld [vmem:[%s1770_s16 + $0x110] sm:$0xff]  ;;  %p1530_p12 = scmp.ne.s32.totalorder %s2104_s23, %s1529_s24  ;;  %s1535_s25 = scalar_lea.vmem %s1534_s30, 9216 }
  0x47   : > { %543 = vmatprep.subr.mxu1 %v394_v10  ;;  %407 = vmatpush1.msra.mxu0 %v297_v11  ;;  %v388_v18 = vld [vmem:[%s1770_s16 + $0x410] sm:$0xff]  ;;  %v291_v19 = vld [vmem:[%s1770_s16 + $0x108] sm:$0xff]  ;;  %v289_v21 = vld [vmem:[%s1770_s16 + $0xf8] sm:$0xff]  ;;  %p1536_p5 = scmp.lt.s32.totalorder %s2104_s23, %s1534_s30  ;;  %p1537_p7 = scmp.lt.s32.totalorder %s1535_s25, %s1529_s24 }
  0x48   : > { %544 = vmatpush1.msra.mxu1 %v393_v12  ;;  %408 = vmatprep.subr.mxu0 %v295_v13  ;;  %v387_v20 = vld [vmem:[%s1770_s16 + $0x408] sm:$0xff]  ;;  %v385_v22 = vld [vmem:[%s1770_s16 + $0x3f8] sm:$0xff]  ;;  %v288_v23 = vld [vmem:[%s1770_s16 + $0xf0] sm:$0xff]  ;;  %p1531_p13 = pnand %p1530_p12, %p2179_p11 }
  0x49   : > { %545 = vmatprep.subr.mxu1 %v391_v14  ;;  %409 = vmatpush1.msra.mxu0 %v294_v15  ;;  %v384_v24 = vld [vmem:[%s1770_s16 + $0x3f0] sm:$0xff]  ;;  %v286_v25 = vld [vmem:[%s1770_s16 + $0xe0] sm:$0xff]  ;;  %v285_v27 = vld [vmem:[%s1770_s16 + $0xd8] sm:$0xff]  ;;  %p1538_p8 = por %p1537_p7, %p1536_p5 }
  0x4a   : > { %546 = vmatpush1.msra.mxu1 %v390_v16  ;;  %410 = vmatprep.subr.mxu0 %v292_v17  ;;  %v382_v26 = vld [vmem:[%s1770_s16 + $0x3e0] sm:$0xff]  ;;  %v381_v28 = vld [vmem:[%s1770_s16 + $0x3d8] sm:$0xff]  ;;  %v283_v29 = vld [vmem:[%s1770_s16 + $0xc8] sm:$0xff]  ;;  %p1532_p3 = pneg %p1531_p13 }
  0x4b   : > { %547 = vmatprep.subr.mxu1 %v388_v18  ;;  %411 = vmatpush1.msra.mxu0 %v291_v19  ;;  %v379_v30 = vld [vmem:[%s1770_s16 + $0x3c8] sm:$0xff]  ;;  %v282_v31 = vld [vmem:[%s1770_s16 + $0xc0] sm:$0xff]  ;;  %v280_v33 = vld [vmem:[%s1770_s16 + $0xb0] sm:$0xff] }
  0x4c   : > { %548 = vmatpush1.msra.mxu1 %v387_v20  ;;  %412 = vmatprep.subr.mxu0 %v289_v21  ;;  %v378_v32 = vld [vmem:[%s1770_s16 + $0x3c0] sm:$0xff]  ;;  %v376_v34 = vld [vmem:[%s1770_s16 + $0x3b0] sm:$0xff]  ;;  %v279_v35 = vld [vmem:[%s1770_s16 + $0xa8] sm:$0xff]  ;;  %p1539_p9 = pnand %p1538_p8, %p1532_p3 }
  0x4d   : > { %549 = vmatprep.subr.mxu1 %v385_v22  ;;  %413 = vmatpush1.msra.mxu0 %v288_v23  ;;  %v375_v36 = vld [vmem:[%s1770_s16 + $0x3a8] sm:$0xff]  ;;  %v277_v37 = vld [vmem:[%s1770_s16 + $0x98] sm:$0xff]  ;;  %v276_v39 = vld [vmem:[%s1770_s16 + $0x90] sm:$0xff] }
  0x4e   : > { %550 = vmatpush1.msra.mxu1 %v384_v24  ;;  %414 = vmatprep.subr.mxu0 %v286_v25  ;;  %v373_v38 = vld [vmem:[%s1770_s16 + $0x398] sm:$0xff]  ;;  %v372_v40 = vld [vmem:[%s1770_s16 + $0x390] sm:$0xff]  ;;  %v274_v41 = vld [vmem:[%s1770_s16 + $0x80] sm:$0xff] }
  0x4f   : > { %551 = vmatprep.subr.mxu1 %v382_v26  ;;  %415 = vmatpush1.msra.mxu0 %v285_v27  ;;  %v370_v42 = vld [vmem:[%s1770_s16 + $0x380] sm:$0xff]  ;;  %v273_v43 = vld [vmem:[%s1770_s16 + $0x78] sm:$0xff]  ;;  %v271_v45 = vld [vmem:[%s1770_s16 + $0x68] sm:$0xff] }
  0x50   : > { %552 = vmatpush1.msra.mxu1 %v381_v28  ;;  %416 = vmatprep.subr.mxu0 %v283_v29  ;;  %v369_v44 = vld [vmem:[%s1770_s16 + $0x378] sm:$0xff]  ;;  %v367_v46 = vld [vmem:[%s1770_s16 + $0x368] sm:$0xff]  ;;  %v270_v47 = vld [vmem:[%s1770_s16 + $0x60] sm:$0xff] }
  0x51   : > { %553 = vmatprep.subr.mxu1 %v379_v30  ;;  %417 = vmatpush1.msra.mxu0 %v282_v31  ;;  %v366_v48 = vld [vmem:[%s1770_s16 + $0x360] sm:$0xff]  ;;  %v268_v49 = vld [vmem:[%s1770_s16 + $0x50] sm:$0xff]  ;;  %v267_v51 = vld [vmem:[%s1770_s16 + $0x48] sm:$0xff] }
  0x52   : > { %554 = vmatpush1.msra.mxu1 %v378_v32  ;;  %418 = vmatprep.subr.mxu0 %v280_v33  ;;  %v364_v50 = vld [vmem:[%s1770_s16 + $0x350] sm:$0xff]  ;;  %v363_v52 = vld [vmem:[%s1770_s16 + $0x348] sm:$0xff]  ;;  %v265_v53 = vld [vmem:[%s1770_s16 + $0x38] sm:$0xff] }
  0x53   : > { %555 = vmatprep.subr.mxu1 %v376_v34  ;;  %419 = vmatpush1.msra.mxu0 %v279_v35  ;;  %v361_v54 = vld [vmem:[%s1770_s16 + $0x338] sm:$0xff]  ;;  %v264_v55 = vld [vmem:[%s1770_s16 + $0x30] sm:$0xff]  ;;  %v262_v57 = vld [vmem:[%s1770_s16 + $0x20] sm:$0xff] }
  0x54   : > { %556 = vmatpush1.msra.mxu1 %v375_v36  ;;  %420 = vmatprep.subr.mxu0 %v277_v37  ;;  %v360_v56 = vld [vmem:[%s1770_s16 + $0x330] sm:$0xff]  ;;  %v358_v58 = vld [vmem:[%s1770_s16 + $0x320] sm:$0xff]  ;;  %v261_v59 = vld [vmem:[%s1770_s16 + $0x18] sm:$0xff] }
  0x55   : > { %557 = vmatprep.subr.mxu1 %v373_v38  ;;  %421 = vmatpush1.msra.mxu0 %v276_v39  ;;  %v357_v60 = vld [vmem:[%s1770_s16 + $0x318] sm:$0xff]  ;;  %v259_v61 = vld [vmem:[%s1770_s16 + $0x8] sm:$0xff]  ;;  %v258_v63 = vld [vmem:[%s1770_s16] sm:$0xff] }
  0x56   : > { %558 = vmatpush1.msra.mxu1 %v372_v40  ;;  %422 = vmatprep.subr.mxu0 %v274_v41  ;;  %v355_v62 = vld [vmem:[%s1770_s16 + $0x308] sm:$0xff]  ;;  %v354_v1 = vld [vmem:[%s1770_s16 + $0x300] sm:$0xff]  ;;  %v352_v2 = vld [vmem:[%s1770_s16 + $0x2f0] sm:$0xff] }
  0x57   : > { %559 = vmatprep.subr.mxu1 %v370_v42  ;;  %423 = vmatpush1.msra.mxu0 %v273_v43  ;;  %v1842_v3 = vld [vmem:[#allocation2 + $0x10] sm:$0xff]  ;;  %v353_v4 = vld [vmem:[%s1770_s16 + $0x2f8] sm:$0xff]  ;;  %v351_v5 = vld [vmem:[%s1770_s16 + $0x2e8] sm:$0xff] }
  0x58   : > { %560 = vmatpush1.msra.mxu1 %v369_v44  ;;  %424 = vmatprep.subr.mxu0 %v271_v45  ;;  %v305_v6 = vld [vmem:[%s1770_s16 + $0x178] sm:$0xff]  ;;  %v348_v8 = vld [vmem:[%s1770_s16 + $0x2d0] sm:$0xff]  ;;  %v350_v9 = vld [vmem:[%s1770_s16 + $0x2e0] sm:$0xff] }
  0x59   : > { %561 = vmatprep.subr.mxu1 %v367_v46  ;;  %425 = vmatpush1.msra.mxu0 %v270_v47  ;;  %v349_v7 = vld [vmem:[%s1770_s16 + $0x2d8] sm:$0xff]  ;;  %v346_v10 = vld [vmem:[%s1770_s16 + $0x2c0] sm:$0xff]  ;;  %v1852_v11 = vld [vmem:[#allocation2 + $0x28] sm:$0xff] }
  0x5a   : > { %562 = vmatpush1.msra.mxu1 %v366_v48  ;;  %426 = vmatprep.subr.mxu0 %v268_v49  ;;  %v345_v12 = vld [vmem:[%s1770_s16 + $0x2b8] sm:$0xff]  ;;  %v302_v13 = vld [vmem:[%s1770_s16 + $0x160] sm:$0xff]  ;;  %v343_v14 = vld [vmem:[%s1770_s16 + $0x2a8] sm:$0xff] }
  0x5b   : > { %563 = vmatprep.subr.mxu1 %v364_v50  ;;  %427 = vmatpush1.msra.mxu0 %v267_v51  ;;  %v347_v15 = vld [vmem:[%s1770_s16 + $0x2c8] sm:$0xff]  ;;  %v342_v16 = vld [vmem:[%s1770_s16 + $0x2a0] sm:$0xff]  ;;  %v340_v18 = vld [vmem:[%s1770_s16 + $0x290] sm:$0xff] }
  0x5c   : > { %564 = vmatpush1.msra.mxu1 %v363_v52  ;;  %428 = vmatprep.subr.mxu0 %v265_v53  ;;  %v299_v17 = vld [vmem:[%s1770_s16 + $0x148] sm:$0xff]  ;;  %v1863_v19 = vld [vmem:[#allocation2 + $0x40] sm:$0xff]  ;;  %v344_v21 = vld [vmem:[%s1770_s16 + $0x2b0] sm:$0xff] }
  0x5d   : > { %565 = vmatprep.subr.mxu1 %v361_v54  ;;  %429 = vmatpush1.msra.mxu0 %v264_v55  ;;  %v339_v20 = vld [vmem:[%s1770_s16 + $0x288] sm:$0xff]  ;;  %v337_v22 = vld [vmem:[%s1770_s16 + $0x278] sm:$0xff]  ;;  %v296_v23 = vld [vmem:[%s1770_s16 + $0x130] sm:$0xff] }
  0x5e   : > { %566 = vmatpush1.msra.mxu1 %v360_v56  ;;  %430 = vmatprep.subr.mxu0 %v262_v57  ;;  %v336_v24 = vld [vmem:[%s1770_s16 + $0x270] sm:$0xff]  ;;  %v334_v25 = vld [vmem:[%s1770_s16 + $0x260] sm:$0xff]  ;;  %v1873_v26 = vld [vmem:[#allocation2 + $0x58] sm:$0xff] }
  0x5f   : > { %567 = vmatprep.subr.mxu1 %v358_v58  ;;  %431 = vmatpush1.msra.mxu0 %v261_v59  ;;  %v341_v27 = vld [vmem:[%s1770_s16 + $0x298] sm:$0xff]  ;;  %v331_v30 = vld [vmem:[%s1770_s16 + $0x248] sm:$0xff]  ;;  %v330_v31 = vld [vmem:[%s1770_s16 + $0x240] sm:$0xff] }
  0x60   : > { %568 = vmatpush1.msra.mxu1 %v357_v60  ;;  %432 = vmatprep.subr.mxu0 %v259_v61  ;;  %v333_v28 = vld [vmem:[%s1770_s16 + $0x258] sm:$0xff]  ;;  %v338_v32 = vld [vmem:[%s1770_s16 + $0x280] sm:$0xff]  ;;  %v328_v33 = vld [vmem:[%s1770_s16 + $0x230] sm:$0xff] }
  0x61   : > { %569 = vmatprep.subr.mxu1 %v355_v62  ;;  %433 = vmatpush1.msra.mxu0 %v258_v63  ;;  %v293_v29 = vld [vmem:[%s1770_s16 + $0x118] sm:$0xff]  ;;  %v1884_v34 = vld [vmem:[#allocation2 + $0x70] sm:$0xff]  ;;  %v327_v35 = vld [vmem:[%s1770_s16 + $0x228] sm:$0xff] }
  0x62   : > { %570 = vmatpush1.msra.mxu1 %v354_v1  ;;  %434 = vmatprep.subr.mxu0 %v352_v2  ;;  %v290_v36 = vld [vmem:[%s1770_s16 + $0x100] sm:$0xff]  ;;  %v325_v37 = vld [vmem:[%s1770_s16 + $0x218] sm:$0xff]  ;;  %v335_v38 = vld [vmem:[%s1770_s16 + $0x268] sm:$0xff] }
  0x63   : > { %604 = vmatmul.mubr.f32.vlgmr.msra.gmra.mxu1 %v1842_v3  ;;  %1214 = vmatprep.subr.mxu1 %v353_v4  ;;  %v324_v39 = vld [vmem:[%s1770_s16 + $0x210] sm:$0xff]  ;;  %v287_v40 = vld [vmem:[%s1770_s16 + $0xe8] sm:$0xff]  ;;  %v322_v41 = vld [vmem:[%s1770_s16 + $0x200] sm:$0xff] }
  0x64   : > { %435 = vmatpush2.msra.mxu0 %v351_v5  ;;  %1215 = vmatpush3.msra.mxu1 %v305_v6  ;;  %v1895_v42 = vld [vmem:[#allocation2 + $0x88] sm:$0xff]  ;;  %v321_v43 = vld [vmem:[%s1770_s16 + $0x1f8] sm:$0xff]  ;;  %v332_v44 = vld [vmem:[%s1770_s16 + $0x250] sm:$0xff] }
  0x65   : > { %436 = vmatprep.subr.mxu0 %v349_v7  ;;  %609 = vmatprep.mubr.f32.mxu1 %v1620_v0  ;;  %v319_v45 = vld [vmem:[%s1770_s16 + $0x1e8] sm:$0xff]  ;;  %v284_v46 = vld [vmem:[%s1770_s16 + $0xd0] sm:$0xff]  ;;  %v318_v47 = vld [vmem:[%s1770_s16 + $0x1e0] sm:$0xff] }
  0x66   : > { %437 = vmatpush2.msra.mxu0 %v348_v8  ;;  %1216 = vmatprep.subr.mxu1 %v350_v9  ;;  %v316_v48 = vld [vmem:[%s1770_s16 + $0x1d0] sm:$0xff]  ;;  %v1905_v49 = vld [vmem:[#allocation2 + $0xa0] sm:$0xff]  ;;  %v329_v50 = vld [vmem:[%s1770_s16 + $0x238] sm:$0xff] }
  0x67   : > { %438 = vmatprep.subr.mxu0 %v346_v10  ;;  %610 = vmatmul.mubr.f32.gmra.mxu1 %v1852_v11  ;;  %v315_v51 = vld [vmem:[%s1770_s16 + $0x1c8] sm:$0xff]  ;;  %v281_v52 = vld [vmem:[%s1770_s16 + $0xb8] sm:$0xff]  ;;  %v312_v54 = vld [vmem:[%s1770_s16 + $0x1b0] sm:$0xff] }
  0x68   : > { %439 = vmatpush2.msra.mxu0 %v345_v12  ;;  %1217 = vmatpush3.msra.mxu1 %v302_v13  ;;  %v313_v53 = vld [vmem:[%s1770_s16 + $0x1b8] sm:$0xff]  ;;  %v326_v55 = vld [vmem:[%s1770_s16 + $0x220] sm:$0xff]  ;;  %v307_v60 = vld [vmem:[%s1770_s16 + $0x188] sm:$0xff] }
  0x69   : > { %440 = vmatprep.subr.mxu0 %v343_v14  ;;  %1218 = vmatprep.subr.mxu1 %v347_v15  ;;  %v310_v56 = vld [vmem:[%s1770_s16 + $0x1a0] sm:$0xff]  ;;  %v1916_v57 = vld [vmem:[#allocation2 + $0xb8] sm:$0xff]  ;;  %v323_v61 = vld [vmem:[%s1770_s16 + $0x208] sm:$0xff] }
  0x6a   : > { %441 = vmatpush2.msra.mxu0 %v342_v16  ;;  %615 = vmatprep.mubr.f32.mxu1 %v1620_v0  ;;  %v309_v58 = vld [vmem:[%s1770_s16 + $0x198] sm:$0xff]  ;;  %v278_v59 = vld [vmem:[%s1770_s16 + $0xa0] sm:$0xff]  ;;  %v1925_v63 = vld [vmem:[#allocation2 + $0x8] sm:$0xff] }
  0x6b   : > { %1219 = vmatpush3.msra.mxu1 %v299_v17  ;;  %442 = vmatprep.subr.mxu0 %v340_v18  ;;  %v306_v62 = vld [vmem:[%s1770_s16 + $0x180] sm:$0xff]  ;;  %v275_v1 = vld [vmem:[%s1770_s16 + $0x88] sm:$0xff]  ;;  %v1930_v4 = vld [vmem:[#allocation2 + $0xd0] sm:$0xff] }
  0x6c   : > { %616 = vmatmul.mubr.f32.gmra.mxu1 %v1863_v19  ;;  %443 = vmatpush2.msra.mxu0 %v339_v20  ;;  %v1928_v2 = vld [vmem:[#allocation2] sm:$0xff]  ;;  %v1933_v5 = vld [vmem:[%s1770_s16 + $0x478] sm:$0xff]  ;;  %v320_v6 = vld [vmem:[%s1770_s16 + $0x1f0] sm:$0xff] }
  0x6d   : > { %1220 = vmatprep.subr.mxu1 %v344_v21  ;;  %444 = vmatprep.subr.mxu0 %v337_v22  ;;  %v272_v7 = vld [vmem:[%s1770_s16 + $0x70] sm:$0xff]  ;;  %v1940_v8 = vld [vmem:[#allocation2 + $0x20] sm:$0xff]  ;;  %v1948_v10 = vld [vmem:[#allocation2 + $0x18] sm:$0xff] }
  0x6e   : > { %1221 = vmatpush3.msra.mxu1 %v296_v23  ;;  %445 = vmatpush2.msra.mxu0 %v336_v24  ;;  %v1945_v9 = vld [vmem:[%s1770_s16 + $0x460] sm:$0xff]  ;;  %v1950_v12 = vld [vmem:[#allocation2 + $0xe8] sm:$0xff]  ;;  %v317_v13 = vld [vmem:[%s1770_s16 + $0x1d8] sm:$0xff] }
  0x6f   : > { %621 = vmatprep.mubr.f32.mxu1 %v1620_v0  ;;  %446 = vmatprep.subr.mxu0 %v334_v25  ;;  %v269_v14 = vld [vmem:[%s1770_s16 + $0x58] sm:$0xff]  ;;  %v1958_v15 = vld [vmem:[%s1770_s16 + $0x448] sm:$0xff]  ;;  %v314_v17 = vld [vmem:[%s1770_s16 + $0x1c0] sm:$0xff] }
  0x70   : > { %622 = vmatmul.mubr.f32.gmra.mxu1 %v1873_v26  ;;  %1222 = vmatprep.subr.mxu1 %v341_v27  ;;  %v1962_v16 = vld [vmem:[#allocation2 + $0x38] sm:$0xff]  ;;  %v1967_v18 = vld [vmem:[#allocation2 + $0x30] sm:$0xff]  ;;  %v1969_v20 = vld [vmem:[#allocation2 + $0x100] sm:$0xff] }
  0x71   : > { %447 = vmatpush2.msra.mxu0 %v333_v28  ;;  %1223 = vmatpush3.msra.mxu1 %v293_v29  ;;  %v266_v21 = vld [vmem:[%s1770_s16 + $0x40] sm:$0xff]  ;;  %v1975_v22 = vld [vmem:[%s1770_s16 + $0x430] sm:$0xff]  ;;  %v311_v23 = vld [vmem:[%s1770_s16 + $0x1a8] sm:$0xff] }
  0x72   : > { %448 = vmatprep.subr.mxu0 %v331_v30  ;;  %627 = vmatprep.mubr.f32.mxu1 %v1620_v0  ;;  %v232_v24 = vld [vmem:[#allocation2 + $0x50] sm:$0xff]  ;;  %v263_v25 = vld [vmem:[%s1770_s16 + $0x28] sm:$0xff]  ;;  %v1984_v28 = vld [vmem:[#allocation2 + $0x118] sm:$0xff] }
  0x73   : > { %449 = vmatpush2.msra.mxu0 %v330_v31  ;;  %1224 = vmatprep.subr.mxu1 %v338_v32  ;;  %v231_v27 = vld [vmem:[#allocation2 + $0x48] sm:$0xff]  ;;  %v389_v29 = vld [vmem:[%s1770_s16 + $0x418] sm:$0xff]  ;;  %v308_v30 = vld [vmem:[%s1770_s16 + $0x190] sm:$0xff] }
  0x74   : > { %450 = vmatprep.subr.mxu0 %v328_v33  ;;  %628 = vmatmul.mubr.f32.gmra.mxu1 %v1884_v34  ;;  %v260_v31 = vld [vmem:[%s1770_s16 + $0x10] sm:$0xff]  ;;  %v235_v32 = vld [vmem:[#allocation2 + $0x68] sm:$0xff]  ;;  %v386_v33 = vld [vmem:[%s1770_s16 + $0x400] sm:$0xff] }
  0x75   : > { %451 = vmatpush2.msra.mxu0 %v327_v35  ;;  %1225 = vmatpush3.msra.mxu1 %v290_v36  ;;  %v234_v35 = vld [vmem:[#allocation2 + $0x60] sm:$0xff] }
  0x76   : > { %452 = vmatprep.subr.mxu0 %v325_v37  ;;  %1226 = vmatprep.subr.mxu1 %v335_v38  ;;  %v238_v36 = vld [vmem:[#allocation2 + $0x80] sm:$0xff]  ;;  %v237_v37 = vld [vmem:[#allocation2 + $0x78] sm:$0xff]  ;;  %v380_v38 = vld [vmem:[%s1770_s16 + $0x3d0] sm:$0xff] }
  0x77   : > { %453 = vmatpush2.msra.mxu0 %v324_v39  ;;  %633 = vmatprep.mubr.f32.mxu1 %v1620_v0  ;;  %v241_v39 = vld [vmem:[#allocation2 + $0x98] sm:$0xff] }
  0x78   : > { %1227 = vmatpush3.msra.mxu1 %v287_v40  ;;  %454 = vmatprep.subr.mxu0 %v322_v41  ;;  %v240_v40 = vld [vmem:[#allocation2 + $0x90] sm:$0xff]  ;;  %v377_v41 = vld [vmem:[%s1770_s16 + $0x3b8] sm:$0xff] }
  0x79   : > { %634 = vmatmul.mubr.f32.gmra.mxu1 %v1895_v42  ;;  %455 = vmatpush2.msra.mxu0 %v321_v43  ;;  %v244_v43 = vld [vmem:[#allocation2 + $0xb0] sm:$0xff] }
  0x7a   : > { %1228 = vmatprep.subr.mxu1 %v332_v44  ;;  %456 = vmatprep.subr.mxu0 %v319_v45  ;;  %v374_v44 = vld [vmem:[%s1770_s16 + $0x3a0] sm:$0xff]  ;;  %v243_v45 = vld [vmem:[#allocation2 + $0xa8] sm:$0xff] }
  0x7b   : > { %1229 = vmatpush3.msra.mxu1 %v284_v46  ;;  %457 = vmatpush2.msra.mxu0 %v318_v47  ;;  %v371_v46 = vld [vmem:[%s1770_s16 + $0x388] sm:$0xff] }
  0x7c   : > { %639 = vmatprep.mubr.f32.mxu1 %v1620_v0  ;;  %458 = vmatprep.subr.mxu0 %v316_v48  ;;  %v247_v47 = vld [vmem:[#allocation2 + $0xc8] sm:$0xff]  ;;  %v246_v48 = vld [vmem:[#allocation2 + $0xc0] sm:$0xff] }
  0x7d   : > { %640 = vmatmul.mubr.f32.gmra.mxu1 %v1905_v49  ;;  %1230 = vmatprep.subr.mxu1 %v329_v50  ;;  %v368_v50 = vld [vmem:[%s1770_s16 + $0x370] sm:$0xff] }
  0x7e   : > { %459 = vmatpush2.msra.mxu0 %v315_v51  ;;  %1231 = vmatpush3.msra.mxu1 %v281_v52  ;;  %v250_v51 = vld [vmem:[#allocation2 + $0xe0] sm:$0xff]  ;;  %v249_v52 = vld [vmem:[#allocation2 + $0xd8] sm:$0xff] }
  0x7f   : > { %460 = vmatprep.subr.mxu0 %v313_v53  ;;  %645 = vmatprep.mubr.f32.mxu1 %v1620_v0  ;;  %v365_v53 = vld [vmem:[%s1770_s16 + $0x358] sm:$0xff] }
  0x80   : > { %461 = vmatpush2.msra.mxu0 %v312_v54  ;;  %1232 = vmatprep.subr.mxu1 %v326_v55  ;;  %v253_v54 = vld [vmem:[#allocation2 + $0xf8] sm:$0xff]  ;;  %v362_v55 = vld [vmem:[%s1770_s16 + $0x340] sm:$0xff] }
  0x81   : > { %462 = vmatprep.subr.mxu0 %v310_v56  ;;  %646 = vmatmul.mubr.f32.gmra.mxu1 %v1916_v57  ;;  %v252_v56 = vld [vmem:[#allocation2 + $0xf0] sm:$0xff] }
  0x82   : > { %463 = vmatpush2.msra.mxu0 %v309_v58  ;;  %1233 = vmatpush3.msra.mxu1 %v278_v59  ;;  %v359_v58 = vld [vmem:[%s1770_s16 + $0x328] sm:$0xff]  ;;  %v256_v59 = vld [vmem:[#allocation2 + $0x110] sm:$0xff] }
  0x83   : > { %464 = vmatprep.subr.mxu0 %v307_v60  ;;  %1234 = vmatprep.subr.mxu1 %v323_v61  ;;  %v255_v60 = vld [vmem:[#allocation2 + $0x108] sm:$0xff]  ;;  %v356_v61 = vld [vmem:[%s1770_s16 + $0x310] sm:$0xff] }
  0x84   : > { %465 = vmatpush2.msra.mxu0 %v306_v62  ;;  %466 = vmatprep.mubr.f32.mxu0 %v1925_v63 }
  0x85   : > { %651 = vmatprep.mubr.f32.mxu1 %v1620_v0  ;;  %1235 = vmatpush3.msra.mxu1 %v275_v1 }
  0x86   : > { %467 = vmatmul.mubr.f32.vlgmr.msra.gmra.mxu0 %v1928_v2  ;;  %652 = vmatmul.mubr.f32.gmra.mxu1 %v1930_v4 }
  0x87   : > { %1310 = vmatprep.subr.mxu0 %v1933_v5  ;;  %1236 = vmatprep.subr.mxu1 %v320_v6 }
  0x88   : > { %1311 = vmatpush3.msra.mxu0 %v1933_v5  ;;  %1237 = vmatpush3.msra.mxu1 %v272_v7 }
  0x89   : > { %472 = vmatprep.mubr.f32.mxu0 %v1940_v8  ;;  %657 = vmatprep.mubr.f32.mxu1 %v1620_v0 }
  0x8a   : > { %1312 = vmatprep.subr.mxu0 %v1945_v9  ;;  %473 = vmatmul.mubr.f32.gmra.mxu0 %v1948_v10 }
  0x8b   : > { %658 = vmatmul.mubr.f32.gmra.mxu1 %v1950_v12  ;;  %1238 = vmatprep.subr.mxu1 %v317_v13 }
  0x8c   : > { %1313 = vmatpush3.msra.mxu0 %v1945_v9  ;;  %1239 = vmatpush3.msra.mxu1 %v269_v14 }
  0x8d   : > { %1314 = vmatprep.subr.mxu0 %v1958_v15  ;;  %478 = vmatprep.mubr.f32.mxu0 %v1962_v16 }
  0x8e   : > { %663 = vmatprep.mubr.f32.mxu1 %v1620_v0  ;;  %1240 = vmatprep.subr.mxu1 %v314_v17 }
  0x8f   : > { %1315 = vmatpush3.msra.mxu0 %v1958_v15  ;;  %664 = vmatmul.mubr.f32.gmra.mxu1 %v1969_v20 }
  0x90   : > { %479 = vmatmul.mubr.f32.gmra.mxu0 %v1967_v18  ;;  %1241 = vmatpush3.msra.mxu1 %v266_v21 }
  0x91   : > { %1316 = vmatprep.subr.mxu0 %v1975_v22  ;;  %1242 = vmatprep.subr.mxu1 %v311_v23 }
  0x92   : > { %1317 = vmatpush3.msra.mxu0 %v1975_v22  ;;  %484 = vmatprep.mubr.f32.mxu0 %v232_v24 }
  0x93   : > { %669 = vmatprep.mubr.f32.mxu1 %v1620_v0  ;;  %1243 = vmatpush3.msra.mxu1 %v263_v25  ;;  %v383_v0 = vld [vmem:[%s1770_s16 + $0x3e8] sm:$0xff] }
  0x94   : > { %485 = vmatmul.mubr.f32.gmra.mxu0 %v231_v27  ;;  %670 = vmatmul.mubr.f32.gmra.mxu1 %v1984_v28 }
  0x95   : > { %1318 = vmatprep.subr.mxu0 %v389_v29  ;;  %1244 = vmatprep.subr.mxu1 %v308_v30 }
  0x96   : > { %1319 = vmatpush3.msra.mxu0 %v389_v29  ;;  %1245 = vmatpush3.msra.mxu1 %v260_v31 }
  0x97   : > { %490 = vmatprep.mubr.f32.mxu0 %v235_v32  ;;  %740 = vmatprep.mubr.f32.mxu1 %v1925_v63 }
  0x98   : > { %1320 = vmatprep.subr.mxu0 %v386_v33  ;;  %491 = vmatmul.mubr.f32.gmra.mxu0 %v234_v35 }
  0x99   : > { %741 = vmatmul.mubr.f32.vlgmr.msra.gmra.mxu1 %v1928_v2  ;;  %1360 = vmatprep.subr.mxu1 %v1933_v5 }
  0x9a   : > { %1321 = vmatpush3.msra.mxu0 %v386_v33  ;;  %1376 = vmatpush3.msra.mxu1 %v1933_v5 }
  0x9b   : > { %1322 = vmatprep.subr.mxu0 %v383_v0  ;;  %496 = vmatprep.mubr.f32.mxu0 %v238_v36 }
  0x9c   : > { %745 = vmatprep.mubr.f32.mxu1 %v1940_v8  ;;  %1361 = vmatprep.subr.mxu1 %v1945_v9 }
  0x9d   : > { %1323 = vmatpush3.msra.mxu0 %v383_v0  ;;  %746 = vmatmul.mubr.f32.gmra.mxu1 %v1948_v10 }
  0x9e   : > { %497 = vmatmul.mubr.f32.gmra.mxu0 %v237_v37  ;;  %1377 = vmatpush3.msra.mxu1 %v1945_v9 }
  0x9f   : > { %1324 = vmatprep.subr.mxu0 %v380_v38  ;;  %1362 = vmatprep.subr.mxu1 %v1958_v15 }
  0xa0   : > { %1325 = vmatpush3.msra.mxu0 %v380_v38  ;;  %502 = vmatprep.mubr.f32.mxu0 %v241_v39 }
  0xa1   : > { %750 = vmatprep.mubr.f32.mxu1 %v1962_v16  ;;  %1378 = vmatpush3.msra.mxu1 %v1958_v15 }
  0xa2   : > { %503 = vmatmul.mubr.f32.gmra.mxu0 %v240_v40  ;;  %751 = vmatmul.mubr.f32.gmra.mxu1 %v1967_v18 }
  0xa3   : > { %1326 = vmatprep.subr.mxu0 %v377_v41  ;;  %1363 = vmatprep.subr.mxu1 %v1975_v22 }
  0xa4   : > { %1327 = vmatpush3.msra.mxu0 %v377_v41  ;;  %1379 = vmatpush3.msra.mxu1 %v1975_v22 }
  0xa5   : > { %508 = vmatprep.mubr.f32.mxu0 %v244_v43  ;;  %755 = vmatprep.mubr.f32.mxu1 %v232_v24 }
  0xa6   : > { %1328 = vmatprep.subr.mxu0 %v374_v44  ;;  %509 = vmatmul.mubr.f32.gmra.mxu0 %v243_v45 }
  0xa7   : > { %756 = vmatmul.mubr.f32.gmra.mxu1 %v231_v27  ;;  %1364 = vmatprep.subr.mxu1 %v389_v29 }
  0xa8   : > { %1329 = vmatpush3.msra.mxu0 %v374_v44  ;;  %1380 = vmatpush3.msra.mxu1 %v389_v29 }
  0xa9   : > { %1330 = vmatprep.subr.mxu0 %v371_v46  ;;  %514 = vmatprep.mubr.f32.mxu0 %v247_v47 }
  0xaa   : > { %760 = vmatprep.mubr.f32.mxu1 %v235_v32  ;;  %1365 = vmatprep.subr.mxu1 %v386_v33 }
  0xab   : > { %1331 = vmatpush3.msra.mxu0 %v371_v46  ;;  %761 = vmatmul.mubr.f32.gmra.mxu1 %v234_v35 }
  0xac   : > { %515 = vmatmul.mubr.f32.gmra.mxu0 %v246_v48  ;;  %1381 = vmatpush3.msra.mxu1 %v386_v33 }
  0xad   : > { %1332 = vmatprep.subr.mxu0 %v368_v50  ;;  %1366 = vmatprep.subr.mxu1 %v383_v0 }
  0xae   : > { %1333 = vmatpush3.msra.mxu0 %v368_v50  ;;  %520 = vmatprep.mubr.f32.mxu0 %v250_v51 }
  0xaf   : > { %765 = vmatprep.mubr.f32.mxu1 %v238_v36  ;;  %1382 = vmatpush3.msra.mxu1 %v383_v0 }
  0xb0   : > { %521 = vmatmul.mubr.f32.gmra.mxu0 %v249_v52  ;;  %766 = vmatmul.mubr.f32.gmra.mxu1 %v237_v37 }
  0xb1   : > { %1334 = vmatprep.subr.mxu0 %v365_v53  ;;  %1367 = vmatprep.subr.mxu1 %v380_v38 }
  0xb2   : > { %1335 = vmatpush3.msra.mxu0 %v365_v53  ;;  %1383 = vmatpush3.msra.mxu1 %v380_v38 }
  0xb3   : > { %526 = vmatprep.mubr.f32.mxu0 %v253_v54  ;;  %770 = vmatprep.mubr.f32.mxu1 %v241_v39 }
  0xb4   : > { %1336 = vmatprep.subr.mxu0 %v362_v55  ;;  %527 = vmatmul.mubr.f32.gmra.mxu0 %v252_v56 }
  0xb5   : > { %771 = vmatmul.mubr.f32.gmra.mxu1 %v240_v40  ;;  %1368 = vmatprep.subr.mxu1 %v377_v41 }
  0xb6   : > { %1337 = vmatpush3.msra.mxu0 %v362_v55  ;;  %1384 = vmatpush3.msra.mxu1 %v377_v41 }
  0xb7   : > { %1338 = vmatprep.subr.mxu0 %v359_v58  ;;  %532 = vmatprep.mubr.f32.mxu0 %v256_v59 }
  0xb8   : > { %775 = vmatprep.mubr.f32.mxu1 %v244_v43  ;;  %1369 = vmatprep.subr.mxu1 %v374_v44 }
  0xb9   : > { %1339 = vmatpush3.msra.mxu0 %v359_v58  ;;  %776 = vmatmul.mubr.f32.gmra.mxu1 %v243_v45 }
  0xba   : > { %533 = vmatmul.mubr.f32.gmra.mxu0 %v255_v60  ;;  %1385 = vmatpush3.msra.mxu1 %v374_v44 }
  0xbb   : > { %1340 = vmatprep.subr.mxu0 %v356_v61  ;;  %1370 = vmatprep.subr.mxu1 %v371_v46 }
  0xbc   : > { %1341 = vmatpush3.msra.mxu0 %v356_v61  ;;  %780 = vmatprep.mubr.f32.mxu1 %v247_v47 }
  0xbd   : > { %1386 = vmatpush3.msra.mxu1 %v371_v46  ;;  %1342 = vmatprep.mubr.f32.mxu0 %v1842_v3 }
  0xbe   : > { %781 = vmatmul.mubr.f32.gmra.mxu1 %v246_v48  ;;  %1343 = vmatmul.mubr.f32.vlgmr.msra.gmra.mxu0 %v1852_v11 }
  0xbf   : > { %1371 = vmatprep.subr.mxu1 %v368_v50  ;;  %785 = vmatprep.mubr.f32.mxu1 %v250_v51 }
  0xc0   : > { %1387 = vmatpush3.msra.mxu1 %v368_v50  ;;  %1345 = vmatprep.mubr.f32.mxu0 %v1863_v19 }
  0xc1   : > { %1372 = vmatprep.subr.mxu1 %v365_v53 }
  0xc2   : > { %786 = vmatmul.mubr.f32.gmra.mxu1 %v249_v52  ;;  %1346 = vmatmul.mubr.f32.gmra.mxu0 %v1873_v26 }
  0xc3   : > { %1388 = vmatpush3.msra.mxu1 %v365_v53  ;;  %790 = vmatprep.mubr.f32.mxu1 %v253_v54 }
  0xc4   : > { %1373 = vmatprep.subr.mxu1 %v362_v55  ;;  %1348 = vmatprep.mubr.f32.mxu0 %v1884_v34 }
  0xc5   : > { %1389 = vmatpush3.msra.mxu1 %v362_v55 }
  0xc6   : > { %791 = vmatmul.mubr.f32.gmra.mxu1 %v252_v56  ;;  %1374 = vmatprep.subr.mxu1 %v359_v58 }
  0xc7   : > { %1349 = vmatmul.mubr.f32.gmra.mxu0 %v1895_v42  ;;  %795 = vmatprep.mubr.f32.mxu1 %v256_v59 }
  0xc8   : > { %1390 = vmatpush3.msra.mxu1 %v359_v58  ;;  %1351 = vmatprep.mubr.f32.mxu0 %v1905_v49 }
  0xc9   : > { %1375 = vmatprep.subr.mxu1 %v356_v61 }
  0xca   : > { %796 = vmatmul.mubr.f32.gmra.mxu1 %v255_v60 }
  0xcb   : > { %1352 = vmatmul.mubr.f32.gmra.mxu0 %v1916_v57  ;;  %1391 = vmatpush3.msra.mxu1 %v356_v61 }
  0xcc   : > { %1354 = vmatprep.mubr.f32.mxu0 %v1930_v4  ;;  %1357 = vmatprep.mubr.f32.mxu1 %v1969_v20 }
  0xce   : > { %1358 = vmatmul.mubr.f32.vlgmr.msra.gmra.mxu1 %v1984_v28 }
  0xcf   : > { %1355 = vmatmul.mubr.f32.gmra.mxu0 %v1950_v12 }
 0x123   : > { %v605_v3 = vpop.f32.mrf.mxu1 }
 0x125   : > { %v607_v11 = vpop.f32.mrf.mxu1 }
 0x127   : > { %v611_v19 = vpop.f32.mrf.mxu1 }
 0x129   : > { %v613_v26 = vpop.f32.mrf.mxu1 }
 0x12c   : > { %v617_v34 = vpop.f32.mrf.mxu1 }
 0x12e   : > { %v619_v42 = vpop.f32.mrf.mxu1 }
 0x130   : > { %v623_v49 = vpop.f32.mrf.mxu1 }
 0x132   : > { %v625_v62 = vpop.f32.mrf.mxu1 }
 0x134   : > { %v629_v63 = vpop.f32.mrf.mxu1 }
 0x136   : > { %v631_v57 = vpop.f32.mrf.mxu1 }
 0x139   : > { %v635_v1 = vpop.f32.mrf.mxu1 }
 0x13b   : > { %v637_v2 = vpop.f32.mrf.mxu1 }
 0x13d   : > { %v641_v4 = vpop.f32.mrf.mxu1 }
 0x13f   : > { %v643_v5 = vpop.f32.mrf.mxu1 }
 0x141   : > { %v647_v6 = vpop.f32.mrf.mxu1 }
 0x143   : > { %v2029_v7 = vpop.f32.mrf.mxu1 }
 0x146   : > { %v468_v8 = vpop.f32.mrf.mxu0  ;;  %v2031_v10 = vpop.f32.mrf.mxu1 }
 0x147   : > { %v606_v9 = vadd.f32 %v605_v3, %v468_v8 }
 0x148   : > { %v470_v12 = vpop.f32.mrf.mxu0  ;;  %v2036_v14 = vpop.f32.mrf.mxu1 }
 0x149   : > { %930 = vst [vmem:[%s2033_s18] sm:$0xff] %v606_v9  ;;  %v608_v13 = vadd.f32 %v607_v11, %v470_v12 }
 0x14a   : > { %v474_v15 = vpop.f32.mrf.mxu0 }
 0x14b   : > { %931 = vst [vmem:[%s2033_s18 + $0x8] sm:$0xff] %v608_v13  ;;  %v2039_v16 = vpop.f32.mrf.mxu1  ;;  %v612_v17 = vadd.f32 %v611_v19, %v474_v15 }
 0x14c   : > { %v476_v18 = vpop.f32.mrf.mxu0 }
 0x14d   : > { %v2041_v20 = vpop.f32.mrf.mxu1  ;;  %933 = vst [vmem:[%s2033_s18 + $0x18] sm:$0xff] %v612_v17  ;;  %v614_v21 = vadd.f32 %v613_v26, %v476_v18 }
 0x14f   : > { %934 = vst [vmem:[%s2033_s18 + $0x20] sm:$0xff] %v614_v21  ;;  %v2045_v23 = vpop.f32.mrf.mxu1 }
 0x150   : > { %v480_v22 = vpop.f32.mrf.mxu0 }
 0x151   : > { %v618_v24 = vadd.f32 %v617_v34, %v480_v22  ;;  %v2047_v27 = vpop.f32.mrf.mxu1 }
 0x152   : > { %v482_v25 = vpop.f32.mrf.mxu0 }
 0x153   : > { %936 = vst [vmem:[%s2033_s18 + $0x30] sm:$0xff] %v618_v24  ;;  %v620_v28 = vadd.f32 %v619_v42, %v482_v25 }
 0x154   : > { %v486_v29 = vpop.f32.mrf.mxu0  ;;  %v2051_v31 = vpop.f32.mrf.mxu1 }
 0x155   : > { %937 = vst [vmem:[%s2033_s18 + $0x38] sm:$0xff] %v620_v28  ;;  %v624_v30 = vadd.f32 %v623_v49, %v486_v29 }
 0x156   : > { %v488_v32 = vpop.f32.mrf.mxu0  ;;  %v2054_v35 = vpop.f32.mrf.mxu1 }
 0x157   : > { %939 = vst [vmem:[%s2033_s18 + $0x48] sm:$0xff] %v624_v30  ;;  %v626_v33 = vadd.f32 %v625_v62, %v488_v32 }
 0x158   : > { %v492_v0 = vpop.f32.mrf.mxu0 }
 0x159   : > { %940 = vst [vmem:[%s2033_s18 + $0x50] sm:$0xff] %v626_v33  ;;  %v2057_v36 = vpop.f32.mrf.mxu1  ;;  %v630_v37 = vadd.f32 %v629_v63, %v492_v0 }
 0x15a   : > { %v494_v38 = vpop.f32.mrf.mxu0 }
 0x15b   : > { %v2059_v39 = vpop.f32.mrf.mxu1  ;;  %942 = vst [vmem:[%s2033_s18 + $0x60] sm:$0xff] %v630_v37  ;;  %v632_v40 = vadd.f32 %v631_v57, %v494_v38 }
 0x15c   : > { %v1248_v21 = vadd.f32 %v2059_v39, %v2057_v36 }
 0x15d   : > { %943 = vst [vmem:[%s2033_s18 + $0x68] sm:$0xff] %v632_v40  ;;  %v1249_v43 = vpop.f32.mrf.mxu1 }
 0x15e   : > { %v498_v41 = vpop.f32.mrf.mxu0 }
 0x15f   : > { %v636_v44 = vadd.f32 %v635_v1, %v498_v41  ;;  %v1250_v46 = vpop.f32.mrf.mxu1 }
 0x160   : > { %v500_v45 = vpop.f32.mrf.mxu0  ;;  %v1251_v17 = vadd.f32 %v1250_v46, %v1249_v43 }
 0x161   : > { %945 = vst [vmem:[%s2033_s18 + $0x78] sm:$0xff] %v636_v44  ;;  %v638_v47 = vadd.f32 %v637_v2, %v500_v45 }
 0x162   : > { %v504_v48 = vpop.f32.mrf.mxu0  ;;  %v1252_v51 = vpop.f32.mrf.mxu1 }
 0x163   : > { %946 = vst [vmem:[%s2033_s18 + $0x80] sm:$0xff] %v638_v47  ;;  %v642_v50 = vadd.f32 %v641_v4, %v504_v48 }
 0x164   : > { %v506_v52 = vpop.f32.mrf.mxu0  ;;  %v1253_v54 = vpop.f32.mrf.mxu1 }
 0x165   : > { %948 = vst [vmem:[%s2033_s18 + $0x90] sm:$0xff] %v642_v50  ;;  %v644_v53 = vadd.f32 %v643_v5, %v506_v52  ;;  %v1254_v30 = vadd.f32 %v1253_v54, %v1252_v51 }
 0x166   : > { %v510_v55 = vpop.f32.mrf.mxu0 }
 0x167   : > { %949 = vst [vmem:[%s2033_s18 + $0x98] sm:$0xff] %v644_v53  ;;  %v1255_v56 = vpop.f32.mrf.mxu1  ;;  %v648_v58 = vadd.f32 %v647_v6, %v510_v55 }
 0x168   : > { %v512_v59 = vpop.f32.mrf.mxu0 }
 0x169   : > { %v1256_v60 = vpop.f32.mrf.mxu1  ;;  %951 = vst [vmem:[%s2033_s18 + $0xa8] sm:$0xff] %v648_v58  ;;  %v650_v61 = vadd.f32 %v2029_v7, %v512_v59 }
 0x16a   : > { %v1257_v25 = vadd.f32 %v1256_v60, %v1255_v56 }
 0x16b   : > { %952 = vst [vmem:[%s2033_s18 + $0xb0] sm:$0xff] %v650_v61  ;;  %v1258_v11 = vpop.f32.mrf.mxu1 }
 0x16c   : > { %v516_v3 = vpop.f32.mrf.mxu0 }
 0x16d   : > { %v654_v19 = vadd.f32 %v2031_v10, %v516_v3  ;;  %v1259_v34 = vpop.f32.mrf.mxu1 }
 0x16e   : > { %v518_v26 = vpop.f32.mrf.mxu0  ;;  %v1260_v38 = vadd.f32 %v1259_v34, %v1258_v11 }
 0x16f   : > { %954 = vst [vmem:[%s2033_s18 + $0xc0] sm:$0xff] %v654_v19  ;;  %v656_v42 = vadd.f32 %v2036_v14, %v518_v26 }
 0x170   : > { %v522_v49 = vpop.f32.mrf.mxu0  ;;  %v1261_v63 = vpop.f32.mrf.mxu1 }
 0x171   : > { %955 = vst [vmem:[%s2033_s18 + $0xc8] sm:$0xff] %v656_v42  ;;  %v660_v62 = vadd.f32 %v2039_v16, %v522_v49 }
 0x172   : > { %v524_v57 = vpop.f32.mrf.mxu0  ;;  %v1262_v2 = vpop.f32.mrf.mxu1 }
 0x173   : > { %957 = vst [vmem:[%s2033_s18 + $0xd8] sm:$0xff] %v660_v62  ;;  %v662_v1 = vadd.f32 %v2041_v20, %v524_v57 }
 0x174   : > { %v528_v4 = vpop.f32.mrf.mxu0 }
 0x175   : > { %958 = vst [vmem:[%s2033_s18 + $0xe0] sm:$0xff] %v662_v1  ;;  %v1264_v5 = vpop.f32.mrf.mxu1  ;;  %v666_v6 = vadd.f32 %v2045_v23, %v528_v4 }
 0x176   : > { %v530_v7 = vpop.f32.mrf.mxu0 }
 0x177   : > { %v1265_v8 = vpop.f32.mrf.mxu1  ;;  %960 = vst [vmem:[%s2033_s18 + $0xf0] sm:$0xff] %v666_v6  ;;  %v668_v9 = vadd.f32 %v2047_v27, %v530_v7 }
 0x178   : > { %v1266_v47 = vadd.f32 %v1265_v8, %v1264_v5 }
 0x179   : > { %961 = vst [vmem:[%s2033_s18 + $0xf8] sm:$0xff] %v668_v9  ;;  %v1267_v12 = vpop.f32.mrf.mxu1 }
 0x17a   : > { %v534_v10 = vpop.f32.mrf.mxu0 }
 0x17b   : > { %v672_v13 = vadd.f32 %v2051_v31, %v534_v10  ;;  %v1268_v15 = vpop.f32.mrf.mxu1 }
 0x17c   : > { %v536_v14 = vpop.f32.mrf.mxu0  ;;  %v1269_v43 = vadd.f32 %v1268_v15, %v1267_v12 }
 0x17d   : > { %963 = vst [vmem:[%s2033_s18 + $0x108] sm:$0xff] %v672_v13  ;;  %v674_v16 = vadd.f32 %v2054_v35, %v536_v14  ;;  %v1263_v35 = vadd.f32 %v1262_v2, %v1261_v63 }
 0x17e   : > { %v1270_v18 = vpop.f32.mrf.mxu1  ;;  %v1344_v20 = vpop.f32.mrf.mxu0 }
 0x17f   : > { %964 = vst [vmem:[%s2033_s18 + $0x110] sm:$0xff] %v674_v16  ;;  %v873_v22 = vadd.f32 %v1344_v20, %v1251_v17 }
 0x180   : > { %v1271_v23 = vpop.f32.mrf.mxu1  ;;  %v867_v24 = vpop.f32.mrf.mxu0 }
 0x181   : > { %935 = vst [vmem:[%s2033_s18 + $0x28] sm:$0xff] %v873_v22  ;;  %v868_v27 = vadd.f32 %v1248_v21, %v867_v24  ;;  %v1272_v60 = vadd.f32 %v1271_v23, %v1270_v18 }
 0x182   : > { %v1273_v28 = vpop.f32.mrf.mxu1  ;;  %v1347_v29 = vpop.f32.mrf.mxu0 }
 0x183   : > { %932 = vst [vmem:[%s2033_s18 + $0x10] sm:$0xff] %v868_v27  ;;  %v883_v31 = vadd.f32 %v1347_v29, %v1257_v25 }
 0x184   : > { %v1274_v32 = vpop.f32.mrf.mxu1  ;;  %v877_v33 = vpop.f32.mrf.mxu0 }
 0x185   : > { %941 = vst [vmem:[%s2033_s18 + $0x58] sm:$0xff] %v883_v31  ;;  %v878_v0 = vadd.f32 %v1254_v30, %v877_v33  ;;  %v1275_v53 = vadd.f32 %v1274_v32, %v1273_v28 }
 0x186   : > { %v1276_v36 = vpop.f32.mrf.mxu1 }
 0x187   : > { %v1350_v37 = vpop.f32.mrf.mxu0  ;;  %938 = vst [vmem:[%s2033_s18 + $0x40] sm:$0xff] %v878_v0 }
 0x188   : > { %v893_v39 = vadd.f32 %v1350_v37, %v1263_v35  ;;  %v1277_v40 = vpop.f32.mrf.mxu1 }
 0x189   : > { %v887_v41 = vpop.f32.mrf.mxu0  ;;  %v1278_v56 = vadd.f32 %v1277_v40, %v1276_v36 }
 0x18a   : > { %947 = vst [vmem:[%s2033_s18 + $0x88] sm:$0xff] %v893_v39  ;;  %v888_v44 = vadd.f32 %v1260_v38, %v887_v41  ;;  %v1279_v45 = vpop.f32.mrf.mxu1 }
 0x18b   : > { %v1353_v46 = vpop.f32.mrf.mxu0 }
 0x18c   : > { %944 = vst [vmem:[%s2033_s18 + $0x70] sm:$0xff] %v888_v44  ;;  %v903_v48 = vadd.f32 %v1353_v46, %v1269_v43  ;;  %v1280_v50 = vpop.f32.mrf.mxu1 }
 0x18d   : > { %v1281_v51 = vadd.f32 %v1280_v50, %v1279_v45  ;;  %v897_v52 = vpop.f32.mrf.mxu0 }
 0x18e   : > { %953 = vst [vmem:[%s2033_s18 + $0xb8] sm:$0xff] %v903_v48  ;;  %v898_v54 = vadd.f32 %v1266_v47, %v897_v52  ;;  %v1359_v55 = vpop.f32.mrf.mxu1 }
 0x18f   : > { %v1356_v58 = vpop.f32.mrf.mxu0  ;;  %v923_v59 = vadd.f32 %v1359_v55, %v1281_v51 }
 0x190   : > { %950 = vst [vmem:[%s2033_s18 + $0xa0] sm:$0xff] %v898_v54  ;;  %v913_v61 = vadd.f32 %v1356_v58, %v1275_v53  ;;  %v917_v3 = vpop.f32.mrf.mxu1 }
 0x191   : > { %965 = vst [vmem:[%s2033_s18 + $0x118] sm:$0xff] %v923_v59  ;;  %v907_v11 = vpop.f32.mrf.mxu0  ;;  %v918_v19 = vadd.f32 %v1278_v56, %v917_v3 }
 0x192   : > { %959 = vst [vmem:[%s2033_s18 + $0xe8] sm:$0xff] %v913_v61  ;;  %v908_v26 = vadd.f32 %v1272_v60, %v907_v11 }
 0x193   : > { %962 = vst [vmem:[%s2033_s18 + $0x100] sm:$0xff] %v918_v19 }
 0x194   : > { %956 = vst [vmem:[%s2033_s18 + $0xd0] sm:$0xff] %v908_v26 }
 0x195   : > { %1542 = shalt.err (!%p1539_p9)
}
 0x196   : > { %s1543_s29 = scalar_lea.hbm %s2101_s4, 4608  ;;  %s1547_s15 = scalar_lea.hbm %s2157_s2, 9216 }
 0x197   : > { %p1544_p0 = scmp.ne.s32.totalorder %s2101_s4, %s1543_s29  ;;  %p1548_p6 = scmp.lt.s32.totalorder %s2101_s4, %s2157_s2 }
 0x198   : > { %p1549_p10 = scmp.lt.s32.totalorder %s1547_s15, %s1543_s29 }
 0x199   : > { %p1545_p1 = pnand %p1544_p0, %p2179_p11 }
 0x19a   : > { %p1550_p2 = por %p1549_p10, %p1548_p6 }
 0x19b   : > { %p1546_p4 = pneg %p1545_p1 }
 0x19d   : > { %p1551_p12 = pnand %p1550_p2, %p1546_p4 }
 0x19f   : > { %1554 = shalt.err (!%p1551_p12)
}
 0x1a0   : > { %s1622_s27 = smov 384   ;;  %s1623_s16 = smov 768  }
 0x1a1   : > { %s1624_s17 = smov 24  }
 0x1a2   : > { %1401 = dma.vmem_to_hbm [thread:$0]  (%p2179_p11), %s2104_s23, 4608, %s2101_s4, %s1079_s19, %s1622_s27, %s1623_s16, %s1624_s17  }
 0x1a3 PF: > { %s2180_s18 = sld [smem:[#allocation12_spill]]  ;;  %s1110_s12 = sand.u32 1, %s1593_s9  }
 0x1a4   : > { %s2181_s20 = sld [smem:[#allocation11_spill]]  ;;  %s1111_s3 = scalar_lea.sflag [#allocation4], %s1110_s12 }
 0x1a9   : > { %p2182_p13 = scmp.ne.s32.totalorder %s2180_s18, 0 }
 0x1aa   : > { %p2183_p3 = scmp.ge.s32.totalorder %s2181_s20, 2 }
 0x1ac   : > { %p1412_p5 = pnand %p2183_p3, %p2182_p13 }
 0x1ae   : > { %p1413_p7 = pneg %p1412_p5 }
 0x1b0   : > { %1588 = dma.done.wait (%p1413_p7), %s1111_s3, 4608  }
 0x1b1   : > { %1590 = vsyncadd (%p1413_p7), %s1111_s3, 4294962688  ;;  %s19_s14 = sadd.s32 1, %s2181_s20   ;;  %s2184_s9 = smov %s1597_s10 }
 0x1b2   : > { %p16_p8 = scmp.ge.s32.totalorder %s19_s14, 4   ;;  %s2185_s10 = smov %s1601_s11 }
 0x1b3   : > { %s2186_s11 = smov %s1751_s22  ;;  %s2187_s12 = smov %s1609_s13 }
 0x1b4   : > { %s2188_s13 = smov %s2190_s28  ;;  %18 = sbr.rel (!%p16_p8) target bundleno = 7 (0x7), region = 88 }
 0x1b9   :  { %1116 = vsyncpa [#allocation3], 1 }
 0x1ba   :  { %1118 = vsyncpa [#allocation3 + $0x1], 1 }
 0x1bb   :  { %1119 = vsyncpa [#allocation6], 1 }
 0x1bc   :  { %1121 = vsyncpa [#allocation6 + $0x1], 1 }
 0x1bd   :  { %1122 = vsyncpa [#allocation4], 1 }
 0x1be   :  { %1124 = vsyncpa [#allocation4 + $0x1], 1 }

</bundles_post_ra>
